<compile_context>
chip_gen: v7x
topology: tpu7x:2x2x1
jax: 0.10.0
libtpu: 0.0.40
codegen_flags: <defaults>
</compile_context>

<pallas_src>
import jax
import jax.numpy as jnp
from jax.experimental import pallas as pl
from jax.experimental.pallas import tpu as pltpu

TAU = 0.25  # gumbel-softmax temperature used in the module


def _round_up(x, m):
    return (x + m - 1) // m * m


def entity_attn_kernel(h_ref, wf_ref, b_ref, ent_ref, noise_ref, out_ref):
    # logits = h @ (w @ ent.T) + b @ ent.T     (bf16 MXU operands, f32 accumulation)
    logits = jnp.dot(h_ref[...], wf_ref[...],
                     preferred_element_type=jnp.float32)          # (TS, E_p) f32
    logits = logits + b_ref[...]                                   # bias (1, E_p) f32

    # Soft gumbel-softmax over the entity axis, f32 elementwise math.
    y = (logits + noise_ref[...]) * jnp.float32(1.0 / TAU)
    y = y - jnp.max(y, axis=-1, keepdims=True)
    p = jnp.exp(y)
    inv = pl.reciprocal(jnp.sum(p, axis=-1, keepdims=True), approx=True)
    attn = p * inv                                                 # (TS, E_p) f32

    # e_rep = attn @ ent   (bf16 MXU operands, f32 accumulation)
    e_rep = jnp.dot(attn.astype(ent_ref.dtype), ent_ref[...],
                    preferred_element_type=jnp.float32)            # (TS, ns_p)
    out_ref[...] = e_rep.astype(out_ref.dtype)


def entity_attn(h, w, b, ent, noise, *, ts=256):
    """h:(S,n_embd)  w:(n_embd,n_ent_state)  b:(n_ent_state,)  ent:(E,n_ent_state)
    noise:(S,E) standard Gumbel(0,1).  Returns (S, n_ent_state) f32."""
    S, n_embd = h.shape
    E, n_ent_state = ent.shape
    f32 = jnp.float32

    # ---- fold the Linear into the logits matmul (one-time, S-independent) ----
    ent_f = ent.astype(f32)
    w_fused = jnp.dot(w.astype(f32), ent_f.T)                      # (n_embd, E)
    b_fused = jnp.dot(b.astype(f32), ent_f.T)                      # (E,)

    # ---- lane-dense padding: 128 on lane axes, tile S on the sublane axis ----
    n_embd_p = _round_up(n_embd, 128)
    E_p = _round_up(E, 128)
    ns_p = _round_up(n_ent_state, 128)
    TS = min(ts, _round_up(S, 8))
    S_p = _round_up(S, TS)

    NEG = jnp.float32(-1e30)  # kills padded entity columns in the softmax
    h_p = jnp.zeros((S_p, n_embd_p), f32).at[:S, :n_embd].set(h.astype(f32))
    wf_p = jnp.zeros((n_embd_p, E_p), f32).at[:n_embd, :E].set(w_fused)
    b_p = jnp.full((1, E_p), NEG, f32).at[0, :E].set(b_fused)
    ent_p = jnp.zeros((E_p, ns_p), f32).at[:E, :n_ent_state].set(ent_f)
    noise_p = jnp.zeros((S_p, E_p), f32).at[:S, :E].set(noise.astype(f32))

    # bf16 MXU operands (accumulation stays f32 inside the kernel).
    h_bf = h_p.astype(jnp.bfloat16)
    wf_bf = wf_p.astype(jnp.bfloat16)
    ent_bf = ent_p.astype(jnp.bfloat16)

    grid = (S_p // TS,)
    out = pl.pallas_call(
        entity_attn_kernel,
        out_shape=jax.ShapeDtypeStruct((S_p, ns_p), jnp.float32),
        grid=grid,
        in_specs=[
            pl.BlockSpec((TS, n_embd_p), lambda i: (i, 0)),   # h tile (streamed)
            pl.BlockSpec((n_embd_p, E_p), lambda i: (0, 0)),  # fused weight (resident)
            pl.BlockSpec((1, E_p), lambda i: (0, 0)),         # fused bias (resident)
            pl.BlockSpec((E_p, ns_p), lambda i: (0, 0)),      # entity table (resident)
            pl.BlockSpec((TS, E_p), lambda i: (i, 0)),        # gumbel noise (streamed)
        ],
        out_specs=pl.BlockSpec((TS, ns_p), lambda i: (i, 0)),
        compiler_params=pltpu.CompilerParams(
            dimension_semantics=("parallel",)),
    )(h_bf, wf_bf, b_p, ent_bf, noise_p)

    return out[:S, :n_ent_state]


def entity_attn_ref(h, w, b, ent, noise):
    """Pure-JAX reference with the same bf16 matmul-operand precision as the kernel
    (isolates the Pallas implementation; only fp association / approx-reciprocal differ)."""
    f32 = jnp.float32
    ent_f = ent.astype(f32)
    w_fused = jnp.dot(w.astype(f32), ent_f.T)
    b_fused = jnp.dot(b.astype(f32), ent_f.T)
    logits = jnp.dot(h.astype(jnp.bfloat16), w_fused.astype(jnp.bfloat16),
                     preferred_element_type=f32) + b_fused
    y = (logits + noise.astype(f32)) / TAU
    attn = jax.nn.softmax(y, axis=-1)
    return jnp.dot(attn.astype(jnp.bfloat16), ent_f.astype(jnp.bfloat16),
                   preferred_element_type=f32)


if __name__ == "__main__":
    # Small shapes consistent with the module's forward.
    S = 8              # sequence length (rows of h)
    n_embd = 32
    n_ent_state = 64
    num_entities = 16

    key = jax.random.PRNGKey(0)
    k_h, k_w, k_b, k_ent, k_noise = jax.random.split(key, 5)

    # h: hidden states; ent: entity embeddings (torch shape (1, E, n_ent_state); batch squeezed).
    h = jax.random.normal(k_h, (S, n_embd), dtype=jnp.float32)
    ent = jax.random.normal(k_ent, (num_entities, n_ent_state), dtype=jnp.float32)

    # Parameter init mirroring the module's __init__:
    #   xavier_normal_(weight) -> std = sqrt(2 / (fan_in + fan_out)); normal_(bias, 0) -> N(0,1)
    xavier_std = (2.0 / (n_embd + n_ent_state)) ** 0.5
    w = xavier_std * jax.random.normal(k_w, (n_embd, n_ent_state), dtype=jnp.float32)
    b = jax.random.normal(k_b, (n_ent_state,), dtype=jnp.float32)

    # Standard Gumbel(0,1) noise (torch: -log(-log(U))) sampled in JAX.
    # TODO(synk): exact torch RNG stream for gumbel_softmax noise is not reproducible in JAX.
    noise = jax.random.gumbel(k_noise, (S, num_entities), dtype=jnp.float32)

    out = entity_attn(h, w, b, ent, noise)
    out = jax.block_until_ready(out)

    ref = entity_attn_ref(h, w, b, ent, noise)
    assert out.shape == (S, n_ent_state)
    # bf16 MXU operands + approx-reciprocal softmax => loosened tolerance.
    assert jnp.allclose(out, ref, atol=5e-2, rtol=5e-2), "mismatch vs. JAX reference"

    print("KERNEL_OK")
</pallas_src>

<mosaic_0001>
module attributes {stable_mosaic.version = 11 : i64} {
  func.func @entity_attn_kernel(%arg0: i32, %arg1: memref<8x128xbf16, #tpu.memory_space<vmem>>, %arg2: memref<128x128xbf16, #tpu.memory_space<vmem>>, %arg3: memref<1x128xf32, #tpu.memory_space<vmem>>, %arg4: memref<128x128xbf16, #tpu.memory_space<vmem>>, %arg5: memref<8x128xf32, #tpu.memory_space<vmem>>, %arg6: memref<8x128xf32, #tpu.memory_space<vmem>>) attributes {dimension_semantics = [#tpu.dimension_semantics<parallel>], iteration_bounds = array<i64: 1>, scalar_prefetch = 0 : i64, scratch_operands = 0 : i64, tpu.core_type = #tpu.core_type<tc>, window_params = [{transform_indices = @transform_0, window_bounds = array<i64: 8, 128>}, {pipeline_mode = #tpu.pipeline_mode<synchronous>, transform_indices = @transform_1, window_bounds = array<i64: 128, 128>}, {pipeline_mode = #tpu.pipeline_mode<synchronous>, transform_indices = @transform_2, window_bounds = array<i64: 1, 128>}, {pipeline_mode = #tpu.pipeline_mode<synchronous>, transform_indices = @transform_3, window_bounds = array<i64: 128, 128>}, {transform_indices = @transform_4, window_bounds = array<i64: 8, 128>}, {transform_indices = @transform_5, window_bounds = array<i64: 8, 128>}]} {
    %c0 = arith.constant 0 : index
    %c0_0 = arith.constant 0 : index
    %0 = vector.load %arg1[%c0, %c0_0] : memref<8x128xbf16, #tpu.memory_space<vmem>>, vector<8x128xbf16>
    %c0_1 = arith.constant 0 : index
    %c0_2 = arith.constant 0 : index
    %1 = vector.load %arg2[%c0_1, %c0_2] : memref<128x128xbf16, #tpu.memory_space<vmem>>, vector<128x128xbf16>
    %cst = arith.constant dense<0.000000e+00> : vector<8x128xf32>
    %2 = tpu.matmul %0, %1, %cst {dimension_numbers = #tpu.dot_dimension_numbers<[1], [0], [0], [1], [0, 0, 1, 1], [], []>} : vector<8x128xbf16>, vector<128x128xbf16>, vector<8x128xf32> -> vector<8x128xf32>
    %c0_3 = arith.constant 0 : index
    %c0_4 = arith.constant 0 : index
    %3 = vector.load %arg3[%c0_3, %c0_4] : memref<1x128xf32, #tpu.memory_space<vmem>>, vector<1x128xf32>
    %4 = vector.broadcast %3 : vector<1x128xf32> to vector<8x128xf32>
    %5 = arith.addf %2, %4 : vector<8x128xf32>
    %c0_5 = arith.constant 0 : index
    %c0_6 = arith.constant 0 : index
    %6 = vector.load %arg5[%c0_5, %c0_6] : memref<8x128xf32, #tpu.memory_space<vmem>>, vector<8x128xf32>
    %7 = arith.addf %5, %6 : vector<8x128xf32>
    %cst_7 = arith.constant 4.000000e+00 : f32
    %8 = vector.broadcast %cst_7 : f32 to vector<8x128xf32>
    %9 = arith.mulf %7, %8 : vector<8x128xf32>
    %cst_8 = arith.constant dense<0xFF800000> : vector<8xf32>
    %10 = vector.multi_reduction <maximumf>, %9, %cst_8 [1] : vector<8x128xf32> to vector<8xf32>
    %11 = vector.shape_cast %10 : vector<8xf32> to vector<8x1xf32>
    %12 = vector.broadcast %11 : vector<8x1xf32> to vector<8x128xf32>
    %13 = arith.subf %9, %12 : vector<8x128xf32>
    %14 = math.exp %13 : vector<8x128xf32>
    %cst_9 = arith.constant dense<0.000000e+00> : vector<8xf32>
    %15 = vector.multi_reduction <add>, %14, %cst_9 [1] : vector<8x128xf32> to vector<8xf32>
    %16 = vector.shape_cast %15 : vector<8xf32> to vector<8x1xf32>
    %17 = tpu.reciprocal %16 {approx = true} : vector<8x1xf32> -> vector<8x1xf32>
    %18 = vector.broadcast %17 : vector<8x1xf32> to vector<8x128xf32>
    %19 = arith.mulf %14, %18 : vector<8x128xf32>
    %20 = arith.truncf %19 : vector<8x128xf32> to vector<8x128xbf16>
    %c0_10 = arith.constant 0 : index
    %c0_11 = arith.constant 0 : index
    %21 = vector.load %arg4[%c0_10, %c0_11] : memref<128x128xbf16, #tpu.memory_space<vmem>>, vector<128x128xbf16>
    %cst_12 = arith.constant dense<0.000000e+00> : vector<8x128xf32>
    %22 = tpu.matmul %20, %21, %cst_12 {dimension_numbers = #tpu.dot_dimension_numbers<[1], [0], [0], [1], [0, 0, 1, 1], [], []>} : vector<8x128xbf16>, vector<128x128xbf16>, vector<8x128xf32> -> vector<8x128xf32>
    %c0_13 = arith.constant 0 : index
    %c0_14 = arith.constant 0 : index
    %23 = vector.load %arg6[%c0_13, %c0_14] : memref<8x128xf32, #tpu.memory_space<vmem>>, vector<8x128xf32>
    tpu.vector_store %arg6[%c0_13, %c0_14], %22 {strides = array<i32>} : memref<8x128xf32, #tpu.memory_space<vmem>>, vector<8x128xf32>,
    return
  }
  func.func @transform_0(%arg0: i32) -> (i32, i32) {
    %c0_i32 = arith.constant 0 : i32
    %c0_i32_0 = arith.constant 0 : i32
    return %arg0, %c0_i32 : i32, i32
  }
  func.func @transform_1(%arg0: i32) -> (i32, i32) {
    %c0_i32 = arith.constant 0 : i32
    %c0_i32_0 = arith.constant 0 : i32
    %c0_i32_1 = arith.constant 0 : i32
    return %c0_i32, %c0_i32_0 : i32, i32
  }
  func.func @transform_2(%arg0: i32) -> (i32, i32) {
    %c0_i32 = arith.constant 0 : i32
    %c0_i32_0 = arith.constant 0 : i32
    %c0_i32_1 = arith.constant 0 : i32
    return %c0_i32, %c0_i32_0 : i32, i32
  }
  func.func @transform_3(%arg0: i32) -> (i32, i32) {
    %c0_i32 = arith.constant 0 : i32
    %c0_i32_0 = arith.constant 0 : i32
    %c0_i32_1 = arith.constant 0 : i32
    return %c0_i32, %c0_i32_0 : i32, i32
  }
  func.func @transform_4(%arg0: i32) -> (i32, i32) {
    %c0_i32 = arith.constant 0 : i32
    %c0_i32_0 = arith.constant 0 : i32
    return %arg0, %c0_i32 : i32, i32
  }
  func.func @transform_5(%arg0: i32) -> (i32, i32) {
    %c0_i32 = arith.constant 0 : i32
    %c0_i32_0 = arith.constant 0 : i32
    return %arg0, %c0_i32 : i32, i32
  }
}

</mosaic_0001>

<bundles_post_ra>
// kernel: tpu_custom_call.1
= control target key start
LH: loop header
LB: loop body
LE: loop exit
PB: predicated region body
PF: predicated region fallthrough
CT: control target
= control target key end

     0   :  { %10 = vsyncpa [#allocation3], 0  ;;  %s620_s0 = inlined_call_operand.hbm [shape: bf16[8,128], index: 0, kind: input, shape index: {}]   ;;  %s621_s1 = inlined_call_operand.hbm [shape: bf16[128,128], index: 1, kind: input, shape index: {}]   ;;  %s622_s2 = inlined_call_operand.vmem [shape: f32[1,128], index: 2, kind: input, shape index: {}]   ;;  %s623_s3 = inlined_call_operand.hbm [shape: bf16[128,128], index: 3, kind: input, shape index: {}]   ;;  %s624_s4 = inlined_call_operand.vmem [shape: f32[8,128], index: 4, kind: input, shape index: {}]   ;;  %s625_s5 = inlined_call_operand.hbm [shape: f32[8,128], index: 5, kind: output, shape index: {}]  }
   0x1   :  { %11 = vsyncpa [#allocation6], 0 }
   0x2   :  { %12 = vsyncpa [#allocation4], 0  ;;  %s504_s18 = smov [#allocation5]   ;;  %s410_s22 = scalar_lea.hbm %s621_s1, 1024 }
   0x3   :  { %s28_s19 = sshll.u32 %s504_s18, 4  ;;  %p411_p0 = scmp.ne.s32.totalorder %s621_s1, %s410_s22  ;;  %s29_s19 = int_to_ptr.vmem [resolvable:$true] %s28_s19 }
   0x4   :  { %p414_p1 = scmp.lt.u32.totalorder %s410_s22, %s621_s1 }
   0x6   :  { %p416_p2 = pnand %p414_p1, %p411_p0 }
   0x8   :  { %419 = shalt.err (!%p416_p2)
}
   0x9   :  { %s420_s27 = scalar_lea.vmem %s29_s19, 1024  ;;  %p425_p4 = scmp.lt.s32.totalorder %s29_s19, %s29_s19 }
   0xa   :  { %p421_p3 = scmp.ne.s32.totalorder %s29_s19, %s420_s27  ;;  %p426_p5 = scmp.lt.s32.totalorder %s420_s27, %s420_s27 }
   0xc   :  { %p427_p6 = por %p426_p5, %p425_p4 }
   0xe   :  { %p428_p7 = pnand %p427_p6, %p421_p3 }
  0x10   :  { %431 = shalt.err (!%p428_p7)
}
  0x11   :  { %s505_s28 = smov 64   ;;  %s506_s29 = smov 4  }
  0x12   :  { %34 = dma.hbm_to_vmem [thread:$0]  %s621_s1, 1024, %s29_s19, [#allocation6], %s505_s28, %s505_s28, %s506_s29  }
  0x13   :  { %s507_s7 = smov [#allocation2]   ;;  %s508_s9 = smov [#allocation7]  }
  0x14   :  { %s19_s8 = sshll.u32 %s507_s7, 4  ;;  %s42_s10 = sshll.u32 %s508_s9, 4  ;;  %s20_s8 = int_to_ptr.vmem [resolvable:$true] %s19_s8  ;;  %s43_s10 = int_to_ptr.vmem [resolvable:$true] %s42_s10 }
  0x15   :  { %s432_s13 = scalar_lea.hbm %s620_s0, 64 }
  0x16   :  { %p433_p8 = scmp.ne.s32.totalorder %s620_s0, %s432_s13  ;;  %p436_p9 = scmp.lt.u32.totalorder %s432_s13, %s620_s0 }
  0x18   :  { %p438_p10 = pnand %p436_p9, %p433_p8 }
  0x1a   :  { %441 = shalt.err (!%p438_p10)
}
  0x1b   :  { %s442_s1 = scalar_lea.vmem %s20_s8, 64  ;;  %p447_p12 = scmp.lt.s32.totalorder %s20_s8, %s20_s8 }
  0x1c   :  { %p443_p11 = scmp.ne.s32.totalorder %s20_s8, %s442_s1  ;;  %p448_p13 = scmp.lt.s32.totalorder %s442_s1, %s442_s1 }
  0x1e   :  { %p449_p0 = por %p448_p13, %p447_p12 }
  0x20   :  { %p450_p1 = pnand %p449_p0, %p443_p11 }
  0x22   :  { %453 = shalt.err (!%p450_p1)
}
  0x23   :  { %22 = dma.hbm_to_vmem [thread:$0]  %s620_s0, 64, %s20_s8, [#allocation3]  }
  0x24   :  { %s454_s22 = scalar_lea.hbm %s623_s3, 1024 }
  0x25   :  { %p455_p2 = scmp.ne.s32.totalorder %s623_s3, %s454_s22  ;;  %p458_p3 = scmp.lt.u32.totalorder %s454_s22, %s623_s3 }
  0x27   :  { %p460_p4 = pnand %p458_p3, %p455_p2 }
  0x29   :  { %463 = shalt.err (!%p460_p4)
}
  0x2a   :  { %s464_s27 = scalar_lea.vmem %s43_s10, 1024  ;;  %p469_p6 = scmp.lt.s32.totalorder %s43_s10, %s43_s10 }
  0x2b   :  { %p465_p5 = scmp.ne.s32.totalorder %s43_s10, %s464_s27  ;;  %p470_p7 = scmp.lt.s32.totalorder %s464_s27, %s464_s27 }
  0x2d   :  { %p471_p8 = por %p470_p7, %p469_p6 }
  0x2f   :  { %p472_p9 = pnand %p471_p8, %p465_p5 }
  0x31   :  { %475 = shalt.err (!%p472_p9)
}
  0x32   :  { %48 = dma.hbm_to_vmem [thread:$0]  %s623_s3, 1024, %s43_s10, [#allocation6], %s505_s28, %s505_s28, %s506_s29  }
  0x33   :  { %498 = dma.done.wait [#allocation3], 64  }
  0x34   :  { %499 = vsyncadd [#allocation3], 4294967232 }
  0x35   :  { %500 = dma.done.wait [#allocation6], 2048  }
  0x36   :  { %501 = vsyncadd [#allocation6], 4294965248  ;;  %v509_v0 = vmov 0.0   ;;  %vm510_vm0 = vmmov 0   ;;  %v390_v1 = vld [vmem:[#allocation5] sm:$0xff]   ;;  %v391_v2 = vld [vmem:[#allocation5 + $0x8] sm:$0xff]  }
  0x37   :  { %342 = vmatprep.subr.bf16.mxu0 %v509_v0  ;;  %358 = vmatprep.mubr.msk.bf16.mxu0 %vm510_vm0, %v509_v0  ;;  %v392_v3 = vld [vmem:[#allocation5 + $0x10] sm:$0xff]   ;;  %v393_v4 = vld [vmem:[#allocation5 + $0x18] sm:$0xff]   ;;  %v394_v5 = vld [vmem:[#allocation5 + $0x20] sm:$0xff]  }
  0x38   :  { %362 = vmatprep.subr.bf16.mxu1 %v509_v0  ;;  %378 = vmatprep.mubr.msk.bf16.mxu1 %vm510_vm0, %v509_v0  ;;  %v395_v6 = vld [vmem:[#allocation5 + $0x28] sm:$0xff]   ;;  %v396_v7 = vld [vmem:[#allocation5 + $0x30] sm:$0xff]   ;;  %v397_v8 = vld [vmem:[#allocation5 + $0x38] sm:$0xff]  }
  0x39   :  { %343 = vmatpush3.bf16.msra.mxu0 %v390_v1  ;;  %v61_v9 = vld [vmem:[#allocation2] sm:$0xf]  ;;  %v307_v10 = vld [vmem:[%s622_s2] ss:$0 sm:$0xff]  ;;  %v398_v19 = vld [vmem:[#allocation7] sm:$0xff]   ;;  %s511_s2 = smov [#allocation8]  }
  0x3a   :  { %344 = vmatprep.subr.bf16.mxu0 %v509_v0  ;;  %v173_v12 = vld [vmem:[%s624_s4] sm:$0xff]  ;;  %363 = vmatpush3.bf16.msra.mxu1 %v398_v19  ;;  %v399_v20 = vld [vmem:[#allocation7 + $0x8] sm:$0xff]   ;;  %v402_v27 = vld [vmem:[#allocation7 + $0x20] sm:$0xff]   ;;  %s297_s4 = sshll.u32 %s511_s2, 4  ;;  %s298_s4 = int_to_ptr.vmem [resolvable:$true] %s297_s4 }
  0x3b   :  { %364 = vmatprep.subr.bf16.mxu1 %v509_v0  ;;  %v400_v21 = vld [vmem:[#allocation7 + $0x10] sm:$0xff]   ;;  %v401_v22 = vld [vmem:[#allocation7 + $0x18] sm:$0xff]   ;;  %v403_v28 = vld [vmem:[#allocation7 + $0x28] sm:$0xff]   ;;  %s476_s7 = scalar_lea.vmem %s298_s4, 128  ;;  %p481_p11 = scmp.lt.s32.totalorder %s298_s4, %s298_s4 }
  0x3c   :  { %v404_v29 = vld [vmem:[#allocation7 + $0x30] sm:$0xff]   ;;  %v405_v30 = vld [vmem:[#allocation7 + $0x38] sm:$0xff]   ;;  %p477_p10 = scmp.ne.s32.totalorder %s298_s4, %s476_s7  ;;  %p482_p12 = scmp.lt.s32.totalorder %s476_s7, %s476_s7 }
  0x3d   :  { %345 = vmatpush3.bf16.msra.mxu0 %v391_v2 }
  0x3e   :  { %346 = vmatprep.subr.bf16.mxu0 %v509_v0  ;;  %365 = vmatpush3.bf16.msra.mxu1 %v399_v20  ;;  %p483_p13 = por %p482_p12, %p481_p11 }
  0x3f   :  { %366 = vmatprep.subr.bf16.mxu1 %v509_v0 }
  0x40   :  { %p484_p0 = pnand %p483_p13, %p477_p10 }
  0x41   :  { %347 = vmatpush3.bf16.msra.mxu0 %v392_v3 }
  0x42   :  { %348 = vmatprep.subr.bf16.mxu0 %v509_v0  ;;  %367 = vmatpush3.bf16.msra.mxu1 %v400_v21 }
  0x43   :  { %368 = vmatprep.subr.bf16.mxu1 %v509_v0 }
  0x45   :  { %349 = vmatpush3.bf16.msra.mxu0 %v393_v4 }
  0x46   :  { %350 = vmatprep.subr.bf16.mxu0 %v509_v0  ;;  %369 = vmatpush3.bf16.msra.mxu1 %v401_v22 }
  0x47   :  { %370 = vmatprep.subr.bf16.mxu1 %v509_v0 }
  0x49   :  { %351 = vmatpush3.bf16.msra.mxu0 %v394_v5 }
  0x4a   :  { %352 = vmatprep.subr.bf16.mxu0 %v509_v0  ;;  %371 = vmatpush3.bf16.msra.mxu1 %v402_v27 }
  0x4b   :  { %372 = vmatprep.subr.bf16.mxu1 %v509_v0 }
  0x4d   :  { %353 = vmatpush3.bf16.msra.mxu0 %v395_v6 }
  0x4e   :  { %354 = vmatprep.subr.bf16.mxu0 %v509_v0  ;;  %373 = vmatpush3.bf16.msra.mxu1 %v403_v28 }
  0x4f   :  { %374 = vmatprep.subr.bf16.mxu1 %v509_v0 }
  0x51   :  { %355 = vmatpush3.bf16.msra.mxu0 %v396_v7 }
  0x52   :  { %356 = vmatprep.subr.bf16.mxu0 %v509_v0  ;;  %375 = vmatpush3.bf16.msra.mxu1 %v404_v29 }
  0x53   :  { %376 = vmatprep.subr.bf16.mxu1 %v509_v0 }
  0x55   :  { %357 = vmatpush3.bf16.msra.mxu0 %v397_v8 }
  0x56   :  { %377 = vmatpush3.bf16.msra.mxu1 %v405_v30 }
  0x58   :  { %359 = vmatmul.mubr.bf16.vlgmr.msra.gmra.mrb[0].mxu0 %v61_v9 }
 0x12b   :  { %v167_v11 = vpop.f32.mrb[0].mxu0 }
 0x12c   :  { %v168_v13 = vadd.f32 %v307_v10, %v167_v11  ;;  %v360_v14 = vpop.f32.mrb[1].mxu0 }
 0x12d   :  { %v170_v15 = vpop.f32.mrb[2].mxu0 }
 0x12e   :  { %v361_v16 = vpop.f32.mrb[3].mxu0  ;;  %v174_v17 = vadd.f32 %v173_v12, %v168_v13 }
 0x130   :  { %v175_v18 = vmul.f32 4.0, %v174_v17 }
 0x132   :  { %176 = vmax.xlane.f32.xlu0 %v175_v18 }
 0x1bf   :  { %v177_v23 = vpop.xlane.xlu0 %176 }
 0x1c0   :  { %v178_v24 = vsub.f32 %v175_v18, %v177_v23 }
 0x1c2   :  { %v179_v25 = vmul.f32 1.442695, %v178_v24 }
 0x1c4   :  { %406 = vpow2.f32 %v179_v25 }
 0x1ce   :  { %v407_v26 = vpop.eup %406 }
 0x1cf   :  { %181 = vadd.xlane.f32.xlu0 %v407_v26 }
 0x25c   :  { %v182_v31 = vpop.xlane.xlu0 %181 }
 0x25d   :  { %408 = vrcp.f32 %v182_v31 }
 0x267   :  { %v409_v32 = vpop.eup %408 }
 0x268   :  { %v184_v33 = vmul.f32 %v409_v32, %v407_v26 }
 0x26a   :  { %v185_v34 = vpack.c.bf16 %v184_v33, %v184_v33 }
 0x26c   :  { %379 = vmatmul.mubr.bf16.vlgmr.msra.gmra.mrb[0].mxu1 %v185_v34 }
 0x33f   :  { %v284_v35 = vpop.f32.mrb[0].mxu1 }
 0x340   :  { %290 = vst [vmem:[#allocation8] sm:$0xff] %v284_v35  ;;  %v380_v36 = vpop.f32.mrb[1].mxu1 }
 0x341   :  { %v287_v37 = vpop.f32.mrb[2].mxu1 }
 0x342   :  { %487 = shalt.err (!%p484_p0)
}
 0x343   :  { %s488_s10 = scalar_lea.hbm %s625_s5, 128 }
 0x344   :  { %p489_p1 = scmp.ne.s32.totalorder %s625_s5, %s488_s10  ;;  %p492_p2 = scmp.lt.u32.totalorder %s488_s10, %s625_s5 }
 0x346   :  { %p494_p3 = pnand %p492_p2, %p489_p1 }
 0x348   :  { %497 = shalt.err (!%p494_p3)
}
 0x349   :  { %300 = dma.vmem_to_hbm [thread:$0]  %s298_s4, 128, %s625_s5, [#allocation4]   ;;  %v381_v38 = vpop.f32.mrb[3].mxu1 }
 0x34a   :  { %502 = dma.done.wait [#allocation4], 128  }
 0x34b   :  { %503 = vsyncadd [#allocation4], 4294967168 }
 0x34c   :  { %304 = vsyncpa [#allocation3], 1 }
 0x34d   :  { %305 = vsyncpa [#allocation6], 1 }
 0x34e   :  { %306 = vsyncpa [#allocation4], 1 }

</bundles_post_ra>
